<compile_context>
chip_gen: v7x
topology: tpu7x:2x2x1
jax: 0.10.0
libtpu: 0.0.40
codegen_flags: <defaults>
</compile_context>

<pallas_src>
import jax
import jax.numpy as jnp
import numpy as np
from jax.experimental import pallas as pl
from jax.experimental.pallas import tpu as pltpu


def _msg_add_kernel(msg_aux_ref, hidden_ref, out_ref):
    # msg_aux_ref: (bB, H, 1)       message embedding, resident across T-tiles
    # hidden_ref:  (bB, H, tile_t)  current time-tile block
    # out_ref:     (bB, H, tile_t)
    out_ref[...] = hidden_ref[...] + msg_aux_ref[...]   # broadcast over lanes (T)


def _chip_config():
    """Return (max_tile_bytes, vmem_limit_bytes, is_v7x) for the local chip."""
    try:
        kind = jax.devices()[0].device_kind.lower()
    except Exception:  # pragma: no cover - defensive
        kind = ""
    if "v7" in kind:
        # 2 arrays x 2 buffers x 8 MiB = 32 MiB; needs an explicit bump above
        # the 32 MiB scoped default but fits v7x's 64 MiB physical VMEM.
        return 8 << 20, 48 << 20, True
    if "v6" in kind:
        return 8 << 20, 48 << 20, False
    if "v5" in kind:
        # Keep well inside v5e's 16 MiB scoped-VMEM default (2x2x2 MiB = 8 MiB).
        return 2 << 20, None, False
    # Unknown chip: conservative.
    return 2 << 20, None, False


def _pick_tile_t(T_pad, max_lanes):
    """Largest multiple of 128 that divides T_pad and is <= max_lanes."""
    max_lanes = max(128, (max_lanes // 128) * 128)
    best, t = 128, 128
    while t <= min(T_pad, max_lanes):
        if T_pad % t == 0:
            best = t
        t += 128
    return best


def msg_processor_forward(hidden, msg, emb):
    """hidden: (B, H, T), msg: (B, nbits) int, emb: (2*nbits, H) -> (B, H, T).

    NOTE: the pallas_call aliases its output onto `hidden`; for that to avoid
    an extra HBM copy the caller should donate `hidden`
    (e.g. jax.jit(msg_processor_forward, donate_argnums=(0,))).
    """
    B, H, T = hidden.shape
    nbits = msg.shape[1]
    assert emb.shape == (2 * nbits, H)
    itemsize = jnp.dtype(hidden.dtype).itemsize

    # Tiny gather + sum over bits in plain XLA (trivial vs. the (B,H,T) stream).
    idx = 2 * jnp.arange(nbits, dtype=jnp.int32)[None, :] + msg.astype(jnp.int32)
    msg_aux = jnp.take(emb, idx, axis=0).sum(axis=1)            # (B, H)
    msg_aux = msg_aux[:, :, None].astype(hidden.dtype)          # (B, H, 1)

    # Pad T to a multiple of 128: keeps every block lane-dense (unmasked vst)
    # and block bytes predictable, regardless of the caller's T.
    T_pad = ((T + 127) // 128) * 128
    hidden_p = hidden if T_pad == T else jnp.pad(
        hidden, ((0, 0), (0, 0), (0, T_pad - T)))

    max_tile_bytes, vmem_limit, is_v7x = _chip_config()

    # Fold batch into the block when a (B, H, 128) slab is tiny vs the budget
    # (the common audioseal case: H=32, small B).
    fold_batch = B * H * 128 * itemsize <= max_tile_bytes
    bytes_per_lane = (B if fold_batch else 1) * H * itemsize

    max_lanes = max_tile_bytes // bytes_per_lane
    if fold_batch and is_v7x and T_pad >= 256:
        # v7x megacore: keep >= 2 parallel T-steps so both TensorCores stream.
        max_lanes = min(max_lanes, T_pad // 2)
    tile_t = _pick_tile_t(T_pad, max_lanes)

    if fold_batch:
        grid = (T_pad // tile_t,)
        in_specs = [
            pl.BlockSpec((B, H, 1), lambda t: (0, 0, 0)),          # msg_aux, resident
            pl.BlockSpec((B, H, tile_t), lambda t: (0, 0, t)),     # hidden tile
        ]
        out_spec = pl.BlockSpec((B, H, tile_t), lambda t: (0, 0, t))
        dims = ("parallel",)
    else:
        grid = (B, T_pad // tile_t)
        in_specs = [
            pl.BlockSpec((1, H, 1), lambda b, t: (b, 0, 0)),       # msg_aux, per-batch
            pl.BlockSpec((1, H, tile_t), lambda b, t: (b, 0, t)),  # hidden tile
        ]
        out_spec = pl.BlockSpec((1, H, tile_t), lambda b, t: (b, 0, t))
        dims = ("parallel", "parallel")

    cost = pl.CostEstimate(
        flops=int(B * H * T_pad),
        transcendentals=0,
        bytes_accessed=int(2 * B * H * T_pad * itemsize + B * H * itemsize),
    )

    out = pl.pallas_call(
        _msg_add_kernel,
        out_shape=jax.ShapeDtypeStruct((B, H, T_pad), hidden.dtype),
        grid=grid,
        in_specs=in_specs,
        out_specs=out_spec,
        input_output_aliases={1: 0},   # out aliases (padded) hidden
        compiler_params=pltpu.CompilerParams(
            dimension_semantics=dims,
            vmem_limit_bytes=vmem_limit,
        ),
        cost_estimate=cost,
    )(msg_aux, hidden_p)

    return out if T_pad == T else out[:, :, :T]


def msg_processor_reference(hidden, msg, emb):
    nbits = msg.shape[-1]
    idx = 2 * jnp.arange(nbits, dtype=jnp.int32)[None, :] + msg.astype(jnp.int32)
    msg_aux = emb[idx].sum(axis=-2)                              # (B, H)
    return hidden + msg_aux[:, :, None]


if __name__ == "__main__":
    nbits = 8
    hidden_size = 32
    B, T = 2, 256   # T a multiple of 128 so time-tiles are lane-dense

    key = jax.random.PRNGKey(0)
    k_hidden, k_msg, k_emb = jax.random.split(key, 3)

    hidden = jax.random.normal(k_hidden, (B, hidden_size, T), dtype=jnp.float32)
    msg = jax.random.bernoulli(k_msg, 0.5, (B, nbits)).astype(jnp.int32)
    # deterministic "Embedding" weight init (nn.Embedding ~ N(0,1) by default)
    emb = jax.random.normal(k_emb, (2 * nbits, hidden_size), dtype=jnp.float32)

    # Reference first (hidden is donated to the kernel call below).
    ref = msg_processor_reference(hidden, msg, emb)
    ref = jax.block_until_ready(ref)

    fwd = jax.jit(msg_processor_forward, donate_argnums=(0,))
    out = fwd(hidden, msg, emb)
    out = jax.block_until_ready(out)

    np.testing.assert_allclose(np.asarray(out), np.asarray(ref), rtol=1e-5, atol=1e-5)

    print("KERNEL_OK")
</pallas_src>

<mosaic_0001>
module attributes {stable_mosaic.version = 11 : i64} {
  func.func @_msg_add_kernel(%arg0: i32, %arg1: memref<2x32x1xf32, #tpu.memory_space<vmem>>, %arg2: memref<2x32x256xf32, #tpu.memory_space<vmem>>, %arg3: memref<2x32x256xf32, #tpu.memory_space<vmem>>) attributes {dimension_semantics = [#tpu.dimension_semantics<parallel>], iteration_bounds = array<i64: 1>, scalar_prefetch = 0 : i64, scratch_operands = 0 : i64, tpu.core_type = #tpu.core_type<tc>, window_params = [{pipeline_mode = #tpu.pipeline_mode<synchronous>, transform_indices = @transform_0, window_bounds = array<i64: 2, 32, 1>}, {transform_indices = @transform_1, window_bounds = array<i64: 2, 32, 256>}, {transform_indices = @transform_2, window_bounds = array<i64: 2, 32, 256>}]} {
    %c0 = arith.constant 0 : index
    %c0_0 = arith.constant 0 : index
    %c0_1 = arith.constant 0 : index
    %0 = vector.load %arg2[%c0, %c0_0, %c0_1] : memref<2x32x256xf32, #tpu.memory_space<vmem>>, vector<2x32x256xf32>
    %c0_2 = arith.constant 0 : index
    %c0_3 = arith.constant 0 : index
    %c0_4 = arith.constant 0 : index
    %1 = vector.load %arg1[%c0_2, %c0_3, %c0_4] : memref<2x32x1xf32, #tpu.memory_space<vmem>>, vector<2x32x1xf32>
    %2 = vector.broadcast %1 : vector<2x32x1xf32> to vector<2x32x256xf32>
    %3 = arith.addf %0, %2 : vector<2x32x256xf32>
    %c0_5 = arith.constant 0 : index
    %c0_6 = arith.constant 0 : index
    %c0_7 = arith.constant 0 : index
    %4 = vector.load %arg3[%c0_5, %c0_6, %c0_7] : memref<2x32x256xf32, #tpu.memory_space<vmem>>, vector<2x32x256xf32>
    tpu.vector_store %arg3[%c0_5, %c0_6, %c0_7], %3 {strides = array<i32>} : memref<2x32x256xf32, #tpu.memory_space<vmem>>, vector<2x32x256xf32>,
    return
  }
  func.func @transform_0(%arg0: i32) -> (i32, i32, i32) {
    %c0_i32 = arith.constant 0 : i32
    %c0_i32_0 = arith.constant 0 : i32
    %c0_i32_1 = arith.constant 0 : i32
    %c0_i32_2 = arith.constant 0 : i32
    return %c0_i32, %c0_i32_0, %c0_i32_1 : i32, i32, i32
  }
  func.func @transform_1(%arg0: i32) -> (i32, i32, i32) {
    %c0_i32 = arith.constant 0 : i32
    %c0_i32_0 = arith.constant 0 : i32
    %c0_i32_1 = arith.constant 0 : i32
    return %c0_i32, %c0_i32_0, %arg0 : i32, i32, i32
  }
  func.func @transform_2(%arg0: i32) -> (i32, i32, i32) {
    %c0_i32 = arith.constant 0 : i32
    %c0_i32_0 = arith.constant 0 : i32
    %c0_i32_1 = arith.constant 0 : i32
    return %c0_i32, %c0_i32_0, %arg0 : i32, i32, i32
  }
}

</mosaic_0001>

<bundles_post_ra>
// kernel: msg_processor_forward.1
= control target key start
LH: loop header
LB: loop body
LE: loop exit
PB: predicated region body
PF: predicated region fallthrough
CT: control target
= control target key end

     0   :  { %7 = vsyncpa [#allocation3], 0  ;;  %s268_s0 = inlined_call_operand.vmem [shape: f32[2,32,1], index: 0, kind: input, shape index: {}]   ;;  %s269_s1 = inlined_call_operand.hbm [shape: f32[2,32,256], index: 1, kind: input, shape index: {}, may-alias: {1,2}]   ;;  %s270_s2 = inlined_call_operand.hbm [shape: f32[2,32,256], index: 2, kind: output, shape index: {}, may-alias: {1,2}]  }
   0x1   :  { %8 = vsyncpa [#allocation4], 0  ;;  %s194_s9 = smov [#allocation2]   ;;  %s146_s13 = scalar_lea.hbm %s269_s1, 2048 }
   0x2   :  { %s16_s10 = sshll.u32 %s194_s9, 4  ;;  %p147_p0 = scmp.ne.s32.totalorder %s269_s1, %s146_s13  ;;  %s17_s10 = int_to_ptr.vmem [resolvable:$true] %s16_s10 }
   0x3   :  { %p150_p1 = scmp.lt.u32.totalorder %s146_s13, %s269_s1 }
   0x5   :  { %p152_p2 = pnand %p150_p1, %p147_p0 }
   0x7   :  { %155 = shalt.err (!%p152_p2)
}
   0x8   :  { %s156_s18 = scalar_lea.vmem %s17_s10, 2048  ;;  %p161_p4 = scmp.lt.s32.totalorder %s17_s10, %s17_s10 }
   0x9   :  { %p157_p3 = scmp.ne.s32.totalorder %s17_s10, %s156_s18  ;;  %p162_p5 = scmp.lt.s32.totalorder %s156_s18, %s156_s18 }
   0xb   :  { %p163_p6 = por %p162_p5, %p161_p4 }
   0xd   :  { %p164_p7 = pnand %p163_p6, %p157_p3 }
   0xf   :  { %167 = shalt.err (!%p164_p7)
}
  0x10   :  { %s195_s19 = smov 256   ;;  %s196_s20 = smov 16  }
  0x11   :  { %22 = dma.hbm_to_vmem [thread:$0]  %s269_s1, 2048, %s17_s10, [#allocation3], %s195_s19, %s195_s19, %s196_s20  }
  0x12   :  { %190 = dma.done.wait [#allocation3], 2048  }
  0x13   :  { %191 = vsyncadd [#allocation3], 4294965248  ;;  %v197_v0 = vmov 0   ;;  %v44_v1 = vld [vmem:[%s268_s0 + $0x10] sm:$0xff]  ;;  %v42_v2 = vld [vmem:[%s268_s0] sm:$0xff] }
  0x14   :  { %145 = vset.pattern.permute.xlu1 %v197_v0  ;;  %144 = vset.pattern.permute.xlu0 %v197_v0  ;;  %v45_v3 = vld [vmem:[%s268_s0 + $0x18] sm:$0xff]  ;;  %v43_v4 = vld [vmem:[%s268_s0 + $0x8] sm:$0xff]  ;;  %v46_v6 = vld [vmem:[%s268_s0 + $0x20] sm:$0xff] }
  0x15   :  { %62 = vperm.xlu1 %145, %v44_v1   ;;  %52 = vperm.xlu0 %144, %v42_v2   ;;  %v47_v5 = vld [vmem:[%s268_s0 + $0x28] sm:$0xff]  ;;  %v49_v7 = vld [vmem:[%s268_s0 + $0x38] sm:$0xff]  ;;  %v48_v8 = vld [vmem:[%s268_s0 + $0x30] sm:$0xff]  ;;  %s198_s0 = smov [#allocation5]  }
  0x16   :  { %v30_v9 = vld [vmem:[#allocation2 + $0x20] sm:$0xff]  ;;  %v31_v10 = vld [vmem:[#allocation2 + $0x28] sm:$0xff]  ;;  %v32_v19 = vld [vmem:[#allocation2 + $0x30] sm:$0xff]  ;;  %s127_s10 = sshll.u32 %s198_s0, 4  ;;  %s128_s10 = int_to_ptr.vmem [resolvable:$true] %s127_s10 }
  0x17   :  { %v26_v11 = vld [vmem:[#allocation2] sm:$0xff]  ;;  %v27_v12 = vld [vmem:[#allocation2 + $0x8] sm:$0xff]  ;;  %v33_v20 = vld [vmem:[#allocation2 + $0x38] sm:$0xff]  ;;  %s168_s11 = scalar_lea.vmem %s128_s10, 2048  ;;  %p173_p9 = scmp.lt.s32.totalorder %s128_s10, %s128_s10 }
  0x18   :  { %v28_v21 = vld [vmem:[#allocation2 + $0x10] sm:$0xff]  ;;  %v29_v22 = vld [vmem:[#allocation2 + $0x18] sm:$0xff]  ;;  %v34_v31 = vld [vmem:[#allocation2 + $0x40] sm:$0xff]  ;;  %p169_p8 = scmp.ne.s32.totalorder %s128_s10, %s168_s11  ;;  %p174_p10 = scmp.lt.s32.totalorder %s168_s11, %s168_s11 }
  0x19   :  { %67 = vperm.xlu1 %145, %v45_v3   ;;  %57 = vperm.xlu0 %144, %v43_v4   ;;  %v36_v29 = vld [vmem:[#allocation2 + $0x50] sm:$0xff]  ;;  %v37_v30 = vld [vmem:[#allocation2 + $0x58] sm:$0xff]  ;;  %v35_v32 = vld [vmem:[#allocation2 + $0x48] sm:$0xff] }
  0x1a   :  { %v40_v39 = vld [vmem:[#allocation2 + $0x70] sm:$0xff]  ;;  %v41_v40 = vld [vmem:[#allocation2 + $0x78] sm:$0xff]  ;;  %v38_v41 = vld [vmem:[#allocation2 + $0x60] sm:$0xff]  ;;  %p175_p11 = por %p174_p10, %p173_p9 }
  0x1b   :  { %v39_v42 = vld [vmem:[#allocation2 + $0x68] sm:$0xff] }
  0x1c   :  { %p176_p12 = pnand %p175_p11, %p169_p8 }
  0x1d   :  { %77 = vperm.xlu1 %145, %v47_v5   ;;  %72 = vperm.xlu0 %144, %v46_v6  }
  0x21   :  { %87 = vperm.xlu1 %145, %v49_v7   ;;  %82 = vperm.xlu0 %144, %v48_v8  }
  0x94   :  { %v63_v13 = vpop.permute.xlu1 %62  ;;  %v53_v14 = vpop.permute.xlu0 %52 }
  0x95   :  { %v94_v15 = vadd.f32 %v63_v13, %v30_v9  ;;  %v95_v16 = vadd.f32 %v63_v13, %v31_v10  ;;  %v90_v17 = vadd.f32 %v53_v14, %v26_v11  ;;  %v91_v18 = vadd.f32 %v53_v14, %v27_v12 }
  0x97   :  { %110 = vst [vmem:[#allocation5 + $0x20] sm:$0xff] %v94_v15  ;;  %111 = vst [vmem:[#allocation5 + $0x28] sm:$0xff] %v95_v16 }
  0x98   :  { %106 = vst [vmem:[#allocation5] sm:$0xff] %v90_v17  ;;  %107 = vst [vmem:[#allocation5 + $0x8] sm:$0xff] %v91_v18  ;;  %v68_v23 = vpop.permute.xlu1 %67  ;;  %v58_v24 = vpop.permute.xlu0 %57 }
  0x99   :  { %v96_v25 = vadd.f32 %v68_v23, %v32_v19  ;;  %v97_v26 = vadd.f32 %v68_v23, %v33_v20  ;;  %v92_v27 = vadd.f32 %v58_v24, %v28_v21  ;;  %v93_v28 = vadd.f32 %v58_v24, %v29_v22 }
  0x9b   :  { %112 = vst [vmem:[#allocation5 + $0x30] sm:$0xff] %v96_v25  ;;  %113 = vst [vmem:[#allocation5 + $0x38] sm:$0xff] %v97_v26 }
  0x9c   :  { %108 = vst [vmem:[#allocation5 + $0x10] sm:$0xff] %v92_v27  ;;  %109 = vst [vmem:[#allocation5 + $0x18] sm:$0xff] %v93_v28  ;;  %v78_v33 = vpop.permute.xlu1 %77  ;;  %v73_v34 = vpop.permute.xlu0 %72 }
  0x9d   :  { %v100_v35 = vadd.f32 %v78_v33, %v36_v29  ;;  %v101_v36 = vadd.f32 %v78_v33, %v37_v30  ;;  %v98_v37 = vadd.f32 %v73_v34, %v34_v31  ;;  %v99_v38 = vadd.f32 %v73_v34, %v35_v32 }
  0x9f   :  { %116 = vst [vmem:[#allocation5 + $0x50] sm:$0xff] %v100_v35  ;;  %117 = vst [vmem:[#allocation5 + $0x58] sm:$0xff] %v101_v36 }
  0xa0   :  { %114 = vst [vmem:[#allocation5 + $0x40] sm:$0xff] %v98_v37  ;;  %115 = vst [vmem:[#allocation5 + $0x48] sm:$0xff] %v99_v38  ;;  %v88_v43 = vpop.permute.xlu1 %87  ;;  %v83_v44 = vpop.permute.xlu0 %82 }
  0xa1   :  { %v104_v45 = vadd.f32 %v88_v43, %v40_v39  ;;  %v105_v46 = vadd.f32 %v88_v43, %v41_v40  ;;  %v102_v47 = vadd.f32 %v83_v44, %v38_v41  ;;  %v103_v48 = vadd.f32 %v83_v44, %v39_v42 }
  0xa3   :  { %120 = vst [vmem:[#allocation5 + $0x70] sm:$0xff] %v104_v45  ;;  %121 = vst [vmem:[#allocation5 + $0x78] sm:$0xff] %v105_v46 }
  0xa4   :  { %118 = vst [vmem:[#allocation5 + $0x60] sm:$0xff] %v102_v47  ;;  %119 = vst [vmem:[#allocation5 + $0x68] sm:$0xff] %v103_v48 }
  0xa5   :  { %179 = shalt.err (!%p176_p12)
}
  0xa6   :  { %s180_s14 = scalar_lea.hbm %s270_s2, 2048 }
  0xa7   :  { %p181_p13 = scmp.ne.s32.totalorder %s270_s2, %s180_s14  ;;  %p184_p0 = scmp.lt.u32.totalorder %s180_s14, %s270_s2 }
  0xa9   :  { %p186_p1 = pnand %p184_p0, %p181_p13 }
  0xab   :  { %189 = shalt.err (!%p186_p1)
}
  0xac   :  { %133 = dma.vmem_to_hbm [thread:$0]  %s128_s10, 2048, %s270_s2, [#allocation4], %s195_s19, %s195_s19, %s196_s20  }
  0xad   :  { %192 = dma.done.wait [#allocation4], 2048  }
  0xae   :  { %193 = vsyncadd [#allocation4], 4294965248 }
  0xaf   :  { %137 = vsyncpa [#allocation3], 1 }
  0xb0   :  { %138 = vsyncpa [#allocation4], 1 }

</bundles_post_ra>
